<compile_context>
chip_gen: v5e
topology: v5e:2x2
jax: 0.10.0
libtpu: 0.0.40
codegen_flags: <defaults>
</compile_context>

<pallas_src>
import math

import jax
import jax.numpy as jnp
from jax.experimental import pallas as pl
from jax.experimental.pallas import tpu as pltpu


_TARGET_BLOCK_BYTES = 4 * 1024 * 1024    # ~4 MiB per x/out block
_SMALL_INPUT_BYTES = 256 * 1024          # below this, let XLA fuse the add
_VMEM_CEILING_BYTES = 48 * 1024 * 1024   # stay under v7x's 64 MiB physical VMEM
_VMEM_FLOOR_BYTES = 16 * 1024 * 1024


def _sublane_multiple(dtype) -> int:
    """Rows per fully-packed vreg tile: 8 for f32, 16 for bf16, 32 for int8/fp8."""
    return max(8, 32 // jnp.dtype(dtype).itemsize)


def _vmem_limit(block_bytes) -> int:
    """Explicit scoped-VMEM limit: double-buffered blocks + margin, clamped."""
    footprint = 2 * sum(block_bytes) + (4 << 20)
    return int(min(max(footprint, _VMEM_FLOOR_BYTES), _VMEM_CEILING_BYTES))


def make_positional_encoding(d_model: int, max_len: int = 2048,
                             dtype=jnp.float32) -> jnp.ndarray:
    """Buffer construction, mirrors the PyTorch __init__.

    Built in f32 and cast ONCE to the activation dtype here (init time), so the
    forward pass never pays a per-call slice+convert pass over HBM.
    Odd d_model is guarded (cos half sliced to d_model // 2 columns).
    """
    position = jnp.arange(0, max_len, dtype=jnp.float32)[:, None]             # [L, 1]
    div_term = jnp.exp(
        jnp.arange(0, d_model, 2, dtype=jnp.float32) * (-math.log(10000.0) / d_model)
    )                                                                          # [ceil(D/2)]
    angles = position * div_term                                               # [L, ceil(D/2)]
    pe = jnp.zeros((max_len, d_model), dtype=jnp.float32)
    pe = pe.at[:, 0::2].set(jnp.sin(angles))
    pe = pe.at[:, 1::2].set(jnp.cos(angles)[:, : d_model // 2])
    return pe.astype(dtype)                                                    # [L, D]


# ---------------------------------------------------------------------------
# Kernels: pure elementwise adds on lane-dense tiles.
#   3-D path: x/pe/out tiles have identical (1, TS, D) shape -> no broadcast.
#   flat path: cheap sublane broadcast of a (1, TC) pe row over fused batch rows.
# ---------------------------------------------------------------------------

def _pe_add_3d_kernel(x_ref, pe_ref, o_ref):
    o_ref[...] = (x_ref[...] + pe_ref[...]).astype(o_ref.dtype)


def _pe_add_flat_kernel(x_ref, pe_ref, o_ref):
    o_ref[...] = (x_ref[...] + pe_ref[...]).astype(o_ref.dtype)


# ---------------------------------------------------------------------------
# Wrappers
# ---------------------------------------------------------------------------

def _pe_add_3d(x: jnp.ndarray, pe_slice: jnp.ndarray) -> jnp.ndarray:
    """Path for d_model % 128 == 0: keep (B, S, D), tile the sequence axis.

    Grid is (seq_tiles, B) with batch INNERMOST: the pe block index (0, s, 0)
    is constant across the batch loop, so its DMA is elided and pe is streamed
    from HBM only once per sequence tile instead of once per (b, s) step.
    """
    B, S, D = x.shape
    itemsize = x.dtype.itemsize
    pe3 = pe_slice[None]                                     # (1, S, D), already x.dtype

    sub = _sublane_multiple(x.dtype)
    rows = max(sub, (_TARGET_BLOCK_BYTES // max(1, D * itemsize)) // sub * sub)
    TS = S if rows >= S else rows                             # TS % sub == 0 or TS == S

    blk_bytes = TS * D * itemsize
    grid = (pl.cdiv(S, TS), B)                                # batch innermost

    return pl.pallas_call(
        _pe_add_3d_kernel,
        out_shape=jax.ShapeDtypeStruct((B, S, D), x.dtype),
        grid_spec=pltpu.PrefetchScalarGridSpec(
            num_scalar_prefetch=0,
            grid=grid,
            in_specs=[
                pl.BlockSpec((1, TS, D), lambda s, b: (b, s, 0)),   # x tile
                pl.BlockSpec((1, TS, D), lambda s, b: (0, s, 0)),   # pe tile (reused over b)
            ],
            out_specs=pl.BlockSpec((1, TS, D), lambda s, b: (b, s, 0)),
        ),
        compiler_params=pltpu.CompilerParams(
            dimension_semantics=("parallel", "parallel"),
            vmem_limit_bytes=_vmem_limit([blk_bytes, blk_bytes, blk_bytes]),
        ),
    )(x, pe3)


def _pe_add_flat(x: jnp.ndarray, pe_slice: jnp.ndarray) -> jnp.ndarray:
    """Path for narrow d_model: flatten (S, D) -> lane-dense S*D, fuse batch.

    Grid is (col_tiles, batch_tiles) with batch tiles INNERMOST so the (1, TC)
    pe row is fetched once per column tile instead of once per (b, c) step.
    """
    B, S, D = x.shape
    C = S * D
    itemsize = x.dtype.itemsize
    sub = _sublane_multiple(x.dtype)

    x2 = x.reshape(B, C)
    pe2 = pe_slice.reshape(1, C)                              # already x.dtype

    # Column (lane) tile: full row if cheap, else a large multiple of 128.
    if C <= 128 or C * itemsize * min(B, sub) <= _TARGET_BLOCK_BYTES:
        TC = C
    else:
        tc = (_TARGET_BLOCK_BYTES // (min(B, sub) * itemsize)) // 128 * 128
        TC = max(128, min((C // 128) * 128, tc))

    # Row (batch) tile: fuse several batch elements per grid step (dtype-aware).
    if B <= sub:
        TB = B
    else:
        TB = min(B, max(sub, (_TARGET_BLOCK_BYTES // (TC * itemsize)) // sub * sub))

    x_blk = TB * TC * itemsize
    pe_blk = TC * itemsize
    grid = (pl.cdiv(C, TC), pl.cdiv(B, TB))                   # batch tile innermost

    out2 = pl.pallas_call(
        _pe_add_flat_kernel,
        out_shape=jax.ShapeDtypeStruct((B, C), x.dtype),
        grid_spec=pltpu.PrefetchScalarGridSpec(
            num_scalar_prefetch=0,
            grid=grid,
            in_specs=[
                pl.BlockSpec((TB, TC), lambda c, b: (b, c)),   # x tile
                pl.BlockSpec((1, TC), lambda c, b: (0, c)),    # pe row (reused over b)
            ],
            out_specs=pl.BlockSpec((TB, TC), lambda c, b: (b, c)),
        ),
        compiler_params=pltpu.CompilerParams(
            dimension_semantics=("parallel", "parallel"),
            vmem_limit_bytes=_vmem_limit([x_blk, x_blk, pe_blk]),
        ),
    )(x2, pe2)
    return out2.reshape(B, S, D)


def positional_encoding_forward(x: jnp.ndarray, pe: jnp.ndarray,
                                *, force_pallas: bool = False) -> jnp.ndarray:
    """x: [B, S, D], pe: [max_len, D] (ideally pre-cast to x.dtype) -> [B, S, D]."""
    B, S, D = x.shape
    if S > pe.shape[0]:
        raise ValueError(f"sequence length {S} exceeds max_len {pe.shape[0]}")
    if D != pe.shape[1]:
        raise ValueError(f"d_model mismatch: x has {D}, pe has {pe.shape[1]}")

    pe_slice = pe[:S, :]
    if pe_slice.dtype != x.dtype:
        # Prefer building pe in the activation dtype at init; this is a fallback.
        pe_slice = pe_slice.astype(x.dtype)

    total_bytes = x.size * x.dtype.itemsize

    # Tiny inputs: launch + per-step overhead exceeds the copy time; XLA's
    # fused elementwise add is already at the HBM roofline there.
    if not force_pallas and total_bytes < _SMALL_INPUT_BYTES:
        return (x + pe_slice[None]).astype(x.dtype)

    # Lane-dense 3-D path only when D is a multiple of 128 and the per-batch
    # slab is big enough that per-step overhead is amortized.
    if D % 128 == 0 and S * D * x.dtype.itemsize >= 128 * 1024:
        return _pe_add_3d(x, pe_slice)
    return _pe_add_flat(x, pe_slice)


if __name__ == "__main__":
    max_len = 2048
    key = jax.random.PRNGKey(0)
    k1, k2, k3 = jax.random.split(key, 3)

    # --- small demo shape matching the module (flattened lane-dense path) ---
    B, S, d_model = 2, 8, 32
    pe_small = make_positional_encoding(d_model, max_len, dtype=jnp.float32)
    x = jax.random.normal(k1, (B, S, d_model), dtype=jnp.float32)
    out = jax.block_until_ready(positional_encoding_forward(x, pe_small, force_pallas=True))
    ref = x + pe_small[None, :S, :]
    assert out.shape == (B, S, d_model)
    assert jnp.allclose(out, ref, atol=1e-6, rtol=1e-6)

    # --- d_model % 128 == 0 path (3-D, seq-tiled, pe reused across batch) ---
    B2, S2, D2 = 2, 128, 256
    pe_wide = make_positional_encoding(D2, max_len, dtype=jnp.float32)
    x2 = jax.random.normal(k2, (B2, S2, D2), dtype=jnp.float32)
    out2 = jax.block_until_ready(positional_encoding_forward(x2, pe_wide, force_pallas=True))
    ref2 = x2 + pe_wide[None, :S2, :]
    assert jnp.allclose(out2, ref2, atol=1e-6, rtol=1e-6)

    # --- bf16 activations through the flattened path (pe pre-cast at init) ---
    B3, S3, D3 = 4, 16, 48
    pe_b = make_positional_encoding(D3, max_len, dtype=jnp.bfloat16)
    x3 = jax.random.normal(k3, (B3, S3, D3), dtype=jnp.float32).astype(jnp.bfloat16)
    out3 = jax.block_until_ready(positional_encoding_forward(x3, pe_b, force_pallas=True))
    ref3 = (x3.astype(jnp.float32)
            + make_positional_encoding(D3, max_len)[None, :S3, :])
    assert out3.dtype == jnp.bfloat16
    assert jnp.allclose(out3.astype(jnp.float32), ref3, atol=1e-2, rtol=1e-2)

    print("KERNEL_OK")
</pallas_src>

<mosaic_0001>
module attributes {stable_mosaic.version = 11 : i64} {
  func.func @_pe_add_flat_kernel(%arg0: i32, %arg1: i32, %arg2: memref<2x256xf32, #tpu.memory_space<vmem>>, %arg3: memref<1x256xf32, #tpu.memory_space<vmem>>, %arg4: memref<2x256xf32, #tpu.memory_space<vmem>>) attributes {dimension_semantics = [#tpu.dimension_semantics<parallel>, #tpu.dimension_semantics<parallel>], iteration_bounds = array<i64: 1, 1>, scalar_prefetch = 0 : i64, scratch_operands = 0 : i64, tpu.core_type = #tpu.core_type<tc>, window_params = [{transform_indices = @transform_0, window_bounds = array<i64: 2, 256>}, {transform_indices = @transform_1, window_bounds = array<i64: 1, 256>}, {transform_indices = @transform_2, window_bounds = array<i64: 2, 256>}]} {
    %c0 = arith.constant 0 : index
    %c0_0 = arith.constant 0 : index
    %0 = vector.load %arg2[%c0, %c0_0] : memref<2x256xf32, #tpu.memory_space<vmem>>, vector<2x256xf32>
    %c0_1 = arith.constant 0 : index
    %c0_2 = arith.constant 0 : index
    %1 = vector.load %arg3[%c0_1, %c0_2] : memref<1x256xf32, #tpu.memory_space<vmem>>, vector<1x256xf32>
    %2 = vector.broadcast %1 : vector<1x256xf32> to vector<2x256xf32>
    %3 = arith.addf %0, %2 : vector<2x256xf32>
    %c0_3 = arith.constant 0 : index
    %c0_4 = arith.constant 0 : index
    %4 = vector.load %arg4[%c0_3, %c0_4] : memref<2x256xf32, #tpu.memory_space<vmem>>, vector<2x256xf32>
    tpu.vector_store %arg4[%c0_3, %c0_4], %3 {strides = array<i32>} : memref<2x256xf32, #tpu.memory_space<vmem>>, vector<2x256xf32>,
    return
  }
  func.func @transform_0(%arg0: i32, %arg1: i32) -> (i32, i32) {
    %c0_i32 = arith.constant 0 : i32
    return %arg1, %arg0 : i32, i32
  }
  func.func @transform_1(%arg0: i32, %arg1: i32) -> (i32, i32) {
    %c0_i32 = arith.constant 0 : i32
    %c0_i32_0 = arith.constant 0 : i32
    return %c0_i32, %arg0 : i32, i32
  }
  func.func @transform_2(%arg0: i32, %arg1: i32) -> (i32, i32) {
    %c0_i32 = arith.constant 0 : i32
    return %arg1, %arg0 : i32, i32
  }
}

</mosaic_0001>

<bundles_post_ra>
// kernel: tpu_custom_call.1
= control target key start
LH: loop header
LB: loop body
LE: loop exit
PB: predicated region body
PF: predicated region fallthrough
CT: control target
= control target key end

     0   :  { %7 = vsyncpa [#allocation3], 0  ;;  %s177_s0 = inlined_call_operand.hbm [shape: f32[2,256], index: 0, kind: input, shape index: {}]   ;;  %s178_s1 = inlined_call_operand.hbm [shape: f32[1,256], index: 1, kind: input, shape index: {}]   ;;  %s179_s2 = inlined_call_operand.hbm [shape: f32[2,256], index: 2, kind: output, shape index: {}]  }
   0x1   :  { %8 = vsyncpa [#allocation6], 0 }
   0x2   :  { %9 = vsyncpa [#allocation4], 0  ;;  %s15_s11 = sshll.u32 %s177_s0, 4  ;;  %s150_s12 = smov [#allocation2]   ;;  %s16_s11 = int_to_ptr.hbm [resolvable:$true] %s15_s11 }
   0x3   :  { %s17_s13 = sshll.u32 %s150_s12, 4  ;;  %s26_s16 = sshll.u32 %s178_s1, 4  ;;  %s18_s13 = int_to_ptr.vmem [resolvable:$true] %s17_s13  ;;  %s27_s16 = int_to_ptr.hbm [resolvable:$true] %s26_s16 }
   0x4   :  { %20 = dma.hbm_to_vmem [thread:$0]  %s16_s11, 64, %s18_s13, [#allocation3]  }
   0x5   :  { %s151_s17 = smov [#allocation5]  }
   0x6   :  { %s28_s18 = sshll.u32 %s151_s17, 4  ;;  %s29_s18 = int_to_ptr.vmem [resolvable:$true] %s28_s18 }
   0x7   :  { %31 = dma.hbm_to_vmem [thread:$0]  %s27_s16, 32, %s29_s18, [#allocation6]  }
   0x8   :  { %144 = dma.done.wait [#allocation3], 64  }
   0x9   :  { %145 = vsyncadd [#allocation3], 4294967232 }
   0xa   :  { %146 = dma.done.wait [#allocation6], 32  }
   0xb   :  { %147 = vsyncadd [#allocation6], 4294967264  ;;  %v41_v0 = vld [vmem:[#allocation5] sm:$0x3]  ;;  %vm46_vm0 = vcmask 1041408   ;;  %s152_s0 = smov [#allocation7]  }
   0xc   :  { %v43_v1 = vperm.slane %v41_v0, 0  ;;  %v44_v2 = vperm.slane %v41_v0, 1  ;;  %v40_v3 = vld [vmem:[#allocation2] sm:$0xf]  ;;  %s56_s19 = sshll.u32 %s152_s0, 4  ;;  %s58_s21 = sshll.u32 %s179_s2, 4  ;;  %s57_s19 = int_to_ptr.vmem [resolvable:$true] %s56_s19  ;;  %s59_s21 = int_to_ptr.hbm [resolvable:$true] %s58_s21 }
   0xe   :  { %v45_v4 = vrot.slane %v44_v2, 6 }
  0x10   :  { %v47_v5 = vsel %vm46_vm0, %v43_v1, %v45_v4 }
  0x11   :  { %v49_v6 = vadd.f32 %v47_v5, %v40_v3 }
  0x13   :  { %50 = vst [vmem:[#allocation7] sm:$0xf] %v49_v6 }
  0x14   :  { %61 = dma.vmem_to_hbm [thread:$0]  %s57_s19, 64, %s59_s21, [#allocation4]  }
  0x15   :  { %148 = dma.done.wait [#allocation4], 64  }
  0x16   :  { %149 = vsyncadd [#allocation4], 4294967232 }
  0x17   :  { %66 = vsyncpa [#allocation3], 1 }
  0x18   :  { %67 = vsyncpa [#allocation6], 1 }
  0x19   :  { %68 = vsyncpa [#allocation4], 1 }

</bundles_post_ra>
